<compile_context>
chip_gen: v6e
topology: v6e:2x2x1
jax: 0.10.0
libtpu: 0.0.40
codegen_flags: <defaults>
</compile_context>

<pallas_src>
import math

import jax
import jax.numpy as jnp
from jax import lax
from jax.experimental import pallas as pl
from jax.experimental.pallas import tpu as pltpu

_INV_SQRT2 = 1.0 / math.sqrt(2.0)


def _round_up(x, m):
    return (x + m - 1) // m * m


def _cdiv(a, b):
    return (a + b - 1) // b


def _gelu_exact_f32(h):
    # torch.nn.GELU() default (erf form), computed in f32.
    return 0.5 * h * (1.0 + lax.erf(h * _INV_SQRT2))


# ----------------------------- kernels --------------------------------------

def _ffn_kernel_resident(x_ref, w1_ref, b1_ref, w2_ref, b2_ref, o_ref):
    """Whole hidden dim resident: one row tile per grid step, no scratch."""
    h = jnp.dot(x_ref[...], w1_ref[...], preferred_element_type=jnp.float32)
    h = _gelu_exact_f32(h + b1_ref[...].astype(jnp.float32))
    # Dropout(p=0.0) / eval mode is identity.
    y = jnp.dot(h.astype(w2_ref.dtype), w2_ref[...],
                preferred_element_type=jnp.float32)
    o_ref[...] = (y + b2_ref[...].astype(jnp.float32)).astype(o_ref.dtype)


def _ffn_kernel_tiled(x_ref, w1_ref, b1_ref, w2_ref, b2_ref, o_ref, acc_ref):
    """Hidden dim tiled: accumulate second-matmul partial sums in f32 scratch."""
    h_idx = pl.program_id(1)

    @pl.when(h_idx == 0)
    def _():
        acc_ref[...] = jnp.zeros_like(acc_ref)

    h = jnp.dot(x_ref[...], w1_ref[...], preferred_element_type=jnp.float32)
    h = _gelu_exact_f32(h + b1_ref[...].astype(jnp.float32))
    # Cast back to the weight dtype so bf16 weights keep the MXU fast path
    # (accumulation stays f32).
    acc_ref[...] += jnp.dot(h.astype(w2_ref.dtype), w2_ref[...],
                            preferred_element_type=jnp.float32)

    @pl.when(h_idx == pl.num_programs(1) - 1)
    def _():
        o_ref[...] = (acc_ref[...] + b2_ref[...].astype(jnp.float32)).astype(o_ref.dtype)


# --------------------------- tile selection ----------------------------------

def _tpu_vmem_and_cores():
    """(per-core VMEM capacity bytes, tensorcores per chip) with safe fallbacks."""
    vmem_cap = None
    try:
        info = pltpu.get_tpu_info()
        cap = getattr(info, "vmem_capacity_bytes", None)
        if cap:
            vmem_cap = int(cap)
    except Exception:
        pass
    if vmem_cap is None:
        try:
            kind = jax.devices()[0].device_kind.lower()
            is_v7 = ("v7" in kind) or ("tpu7" in kind)
            vmem_cap = (64 if is_v7 else 128) * 1024 * 1024
        except Exception:
            vmem_cap = 64 * 1024 * 1024  # conservative
    # v7x: 64 MiB VMEM per TensorCore, 2 TCs/chip; v5e/v6e: 128 MiB, 1 TC.
    num_cores = 2 if vmem_cap <= 80 * 1024 * 1024 else 1
    return vmem_cap, num_cores


def _vmem_bytes(tm, th, dim, x_isz, w_isz, o_isz, tiled):
    """Conservative per-step VMEM estimate (Pallas double-buffers blocks)."""
    b = 2 * tm * dim * x_isz            # x row tile
    b += 2 * tm * dim * o_isz           # output row tile
    b += 2 * dim * th * w_isz           # W1 tile
    b += 2 * th * dim * w_isz           # W2 tile
    b += 2 * (th + dim) * w_isz         # biases (tiny)
    b += 4 * tm * th                    # f32 GELU intermediate
    b += tm * th * w_isz                # cast of the intermediate fed to dot #2
    if tiled:
        b += 4 * tm * dim               # f32 accumulator scratch
    return b


def _select_tiles(M, dim, hidden, x_isz, w_isz, o_isz, vmem_budget, num_cores,
                  tm_user=None, th_user=None):
    """Pick (tm, M_pad, th, hidden_pad)."""
    M16 = _round_up(max(M, 1), 16)

    def tm_for_target(target):
        n = max(_cdiv(M16, target), 1)
        # v7x has two TensorCores: make sure grid axis 0 has >= 2 row tiles so
        # dimension_semantics="parallel" can shard them (otherwise one TC idles).
        if num_cores > 1 and M16 >= 16 * num_cores:
            n = max(n, num_cores)
        tm = _round_up(_cdiv(M16, n), 16)
        return tm, tm * n

    def pick_th(tm):
        if th_user is not None:
            if th_user >= hidden:
                return hidden, hidden
            th = max(128, _round_up(int(th_user), 128))
            return th, _round_up(hidden, th)
        # Prefer weights fully resident: constant index_map => W1/W2 are DMA'd
        # from HBM exactly once for all row tiles (MXU-bound, not HBM-bound).
        if _vmem_bytes(tm, hidden, dim, x_isz, w_isz, o_isz, tiled=False) <= vmem_budget:
            return hidden, hidden
        # Otherwise tile the hidden dim. Prefer th >= 512 and a multiple of 256
        # so the per-step (tm, dim) f32 accumulator RMW stays cheap relative to
        # the MXU work and the second dot keeps a full K dimension.
        fitting = [c for c in (4096, 3072, 2048, 1536, 1024, 512, 256, 128)
                   if c < hidden and
                   _vmem_bytes(tm, c, dim, x_isz, w_isz, o_isz, tiled=True) <= vmem_budget]
        if not fitting:
            return None
        th = next((c for c in fitting if hidden % c == 0), fitting[0])
        return th, _round_up(hidden, th)

    if tm_user is not None:
        tm, M_pad = tm_for_target(max(16, _round_up(int(tm_user), 16)))
        got = pick_th(tm)
        if got is None:
            got = (128, _round_up(hidden, 128))
        return (tm, M_pad) + got

    # Generation/dtype-aware row-tile target.  Weight-stream arithmetic
    # intensity is ~2*tm/bytes_per_elem: v6e (~670 FLOP/B) wants tm ~1024 for
    # bf16 when weights must be streamed; v7x (~311 FLOP/B, 64 MiB VMEM) is
    # fine with ~512; f32 weights use 512 and accept the lower intensity.
    if num_cores > 1:                       # v7x-class
        tm_target = 512
    else:                                   # v5e / v6e (128 MiB VMEM)
        tm_target = 1024 if w_isz <= 2 else 512

    for target in (tm_target, max(256, tm_target // 2), 256, 128, 64, 16):
        tm, M_pad = tm_for_target(max(16, target))
        got = pick_th(tm)
        if got is not None:
            return (tm, M_pad) + got

    tm, M_pad = tm_for_target(16)
    return tm, M_pad, 128, _round_up(hidden, 128)


# ------------------------------ wrapper ---------------------------------------

def feedforward_pallas(x, w1, b1, w2, b2, *, tm=None, th=None):
    """y = GELU(x @ W1 + b1) @ W2 + b2.

    x: (..., dim); w1: (dim, hidden); b1: (hidden,); w2: (hidden, dim); b2: (dim,).
    (Weights are the transpose of PyTorch nn.Linear.weight.)
    """
    orig_shape = x.shape
    dim = orig_shape[-1]
    hidden = w1.shape[1]
    assert w1.shape == (dim, hidden) and w2.shape == (hidden, dim)
    assert b1.shape == (hidden,) and b2.shape == (dim,)

    x2d = x.reshape(-1, dim)
    M = x2d.shape[0]

    x_isz = jnp.dtype(x.dtype).itemsize
    w_isz = jnp.dtype(w1.dtype).itemsize
    o_isz = x_isz

    vmem_cap, num_cores = _tpu_vmem_and_cores()
    vmem_budget = int(0.80 * vmem_cap)

    tm_sel, M_pad, th_sel, hidden_pad = _select_tiles(
        M, dim, hidden, x_isz, w_isz, o_isz, vmem_budget, num_cores, tm, th)

    if M_pad != M:
        x2d = jnp.pad(x2d, ((0, M_pad - M), (0, 0)))

    if hidden_pad != hidden:
        # Zero-padded hidden columns give GELU(0)=0 through zero W2 rows, so
        # the result is unchanged.
        w1 = jnp.pad(w1, ((0, 0), (0, hidden_pad - hidden)))
        b1 = jnp.pad(b1, ((0, hidden_pad - hidden),))
        w2 = jnp.pad(w2, ((0, hidden_pad - hidden), (0, 0)))

    b1_2d = b1.reshape(1, hidden_pad)
    b2_2d = b2.reshape(1, dim)

    resident = th_sel >= hidden_pad
    needed = _vmem_bytes(tm_sel, th_sel, dim, x_isz, w_isz, o_isz, tiled=not resident)
    # Never request more than ~90% of the generation's physical VMEM (v7x only
    # has 64 MiB per TensorCore), never less than the 32 MiB scoped default.
    vmem_limit = int(max(32 * 1024 * 1024, 1.25 * needed))
    vmem_limit = int(min(vmem_limit, 0.90 * vmem_cap))

    if resident:
        out = pl.pallas_call(
            _ffn_kernel_resident,
            out_shape=jax.ShapeDtypeStruct((M_pad, dim), x.dtype),
            grid_spec=pltpu.PrefetchScalarGridSpec(
                num_scalar_prefetch=0,
                grid=(M_pad // tm_sel,),
                in_specs=[
                    pl.BlockSpec((tm_sel, dim), lambda i: (i, 0)),          # x rows
                    pl.BlockSpec((dim, hidden_pad), lambda i: (0, 0)),      # W1 (resident)
                    pl.BlockSpec((1, hidden_pad), lambda i: (0, 0)),        # b1
                    pl.BlockSpec((hidden_pad, dim), lambda i: (0, 0)),      # W2 (resident)
                    pl.BlockSpec((1, dim), lambda i: (0, 0)),               # b2
                ],
                out_specs=pl.BlockSpec((tm_sel, dim), lambda i: (i, 0)),
            ),
            compiler_params=pltpu.CompilerParams(
                dimension_semantics=("parallel",),
                vmem_limit_bytes=vmem_limit,
            ),
        )(x2d, w1, b1_2d, w2, b2_2d)
    else:
        out = pl.pallas_call(
            _ffn_kernel_tiled,
            out_shape=jax.ShapeDtypeStruct((M_pad, dim), x.dtype),
            grid_spec=pltpu.PrefetchScalarGridSpec(
                num_scalar_prefetch=0,
                grid=(M_pad // tm_sel, hidden_pad // th_sel),
                in_specs=[
                    pl.BlockSpec((tm_sel, dim), lambda i, h: (i, 0)),       # x rows
                    pl.BlockSpec((dim, th_sel), lambda i, h: (0, h)),       # W1 hidden tile
                    pl.BlockSpec((1, th_sel), lambda i, h: (0, h)),         # b1 hidden tile
                    pl.BlockSpec((th_sel, dim), lambda i, h: (h, 0)),       # W2 hidden tile
                    pl.BlockSpec((1, dim), lambda i, h: (0, 0)),            # b2
                ],
                out_specs=pl.BlockSpec((tm_sel, dim), lambda i, h: (i, 0)),
                scratch_shapes=[pltpu.VMEM((tm_sel, dim), jnp.float32)],
            ),
            compiler_params=pltpu.CompilerParams(
                dimension_semantics=("parallel", "arbitrary"),
                vmem_limit_bytes=vmem_limit,
            ),
        )(x2d, w1, b1_2d, w2, b2_2d)

    if M_pad != M:
        out = out[:M]
    return out.reshape(orig_shape)


# ------------------------------ reference / test ------------------------------

def _reference(x, w1, b1, w2, b2):
    xf = x.astype(jnp.float32)
    h = xf @ w1.astype(jnp.float32) + b1.astype(jnp.float32)
    h = 0.5 * h * (1.0 + lax.erf(h * _INV_SQRT2))
    y = h @ w2.astype(jnp.float32) + b2.astype(jnp.float32)
    return y.astype(x.dtype)


def _make_params(key, dim, hidden, dtype):
    # PyTorch nn.Linear default init bounds.
    k_w1, k_b1, k_w2, k_b2 = jax.random.split(key, 4)
    bound1 = 1.0 / math.sqrt(dim)
    bound2 = 1.0 / math.sqrt(hidden)
    w1 = jax.random.uniform(k_w1, (dim, hidden), jnp.float32, -bound1, bound1).astype(dtype)
    b1 = jax.random.uniform(k_b1, (hidden,), jnp.float32, -bound1, bound1).astype(dtype)
    w2 = jax.random.uniform(k_w2, (hidden, dim), jnp.float32, -bound2, bound2).astype(dtype)
    b2 = jax.random.uniform(k_b2, (dim,), jnp.float32, -bound2, bound2).astype(dtype)
    return w1, b1, w2, b2


if __name__ == "__main__":
    key = jax.random.PRNGKey(0)
    ks = jax.random.split(key, 6)

    # Tolerances accommodate MXU matmul precision-mode / accumulation-order
    # differences between the fused kernel and the XLA reference.

    # Case 1: module-spec toy shapes (batch=2, seq=8, dim=32, hidden=64), f32,
    # resident-weight fast path.
    dim1, hidden1 = 32, 64
    w1a, b1a, w2a, b2a = _make_params(ks[0], dim1, hidden1, jnp.float32)
    xa = jax.random.normal(ks[1], (2, 8, dim1), jnp.float32)
    ya = jax.block_until_ready(feedforward_pallas(xa, w1a, b1a, w2a, b2a))
    ya_ref = _reference(xa, w1a, b1a, w2a, b2a)
    assert ya.shape == xa.shape
    assert jnp.allclose(ya, ya_ref, atol=2e-2, rtol=2e-2), "case 1 mismatch vs reference"

    # Case 2: forces the tiled-hidden accumulator path (th=256) and exercises
    # both row padding (M=300) and hidden padding (320 -> 512).
    dim2, hidden2 = 128, 320
    w1b, b1b, w2b, b2b = _make_params(ks[2], dim2, hidden2, jnp.float32)
    xb = jax.random.normal(ks[3], (3, 100, dim2), jnp.float32)
    yb = jax.block_until_ready(feedforward_pallas(xb, w1b, b1b, w2b, b2b, th=256))
    yb_ref = _reference(xb, w1b, b1b, w2b, b2b)
    assert yb.shape == xb.shape
    assert jnp.allclose(yb, yb_ref, atol=2e-2, rtol=2e-2), "case 2 mismatch vs reference"

    # Case 3: bf16 activations/weights on the resident path.
    dim3, hidden3 = 128, 256
    w1c, b1c, w2c, b2c = _make_params(ks[4], dim3, hidden3, jnp.bfloat16)
    xc = jax.random.normal(ks[5], (2, 16, dim3), jnp.bfloat16)
    yc = jax.block_until_ready(feedforward_pallas(xc, w1c, b1c, w2c, b2c))
    yc_ref = _reference(xc, w1c, b1c, w2c, b2c)
    assert yc.shape == xc.shape
    assert jnp.allclose(yc.astype(jnp.float32), yc_ref.astype(jnp.float32),
                        atol=6e-2, rtol=6e-2), "case 3 mismatch vs reference"

    print("KERNEL_OK")
</pallas_src>

<mosaic_0001>
module attributes {stable_mosaic.version = 11 : i64} {
  func.func @_ffn_kernel_resident(%arg0: i32, %arg1: memref<16x32xf32, #tpu.memory_space<vmem>>, %arg2: memref<32x64xf32, #tpu.memory_space<vmem>>, %arg3: memref<1x64xf32, #tpu.memory_space<vmem>>, %arg4: memref<64x32xf32, #tpu.memory_space<vmem>>, %arg5: memref<1x32xf32, #tpu.memory_space<vmem>>, %arg6: memref<16x32xf32, #tpu.memory_space<vmem>>) attributes {dimension_semantics = [#tpu.dimension_semantics<parallel>], iteration_bounds = array<i64: 1>, scalar_prefetch = 0 : i64, scratch_operands = 0 : i64, tpu.core_type = #tpu.core_type<tc>, window_params = [{transform_indices = @transform_0, window_bounds = array<i64: 16, 32>}, {pipeline_mode = #tpu.pipeline_mode<synchronous>, transform_indices = @transform_1, window_bounds = array<i64: 32, 64>}, {pipeline_mode = #tpu.pipeline_mode<synchronous>, transform_indices = @transform_2, window_bounds = array<i64: 1, 64>}, {pipeline_mode = #tpu.pipeline_mode<synchronous>, transform_indices = @transform_3, window_bounds = array<i64: 64, 32>}, {pipeline_mode = #tpu.pipeline_mode<synchronous>, transform_indices = @transform_4, window_bounds = array<i64: 1, 32>}, {transform_indices = @transform_5, window_bounds = array<i64: 16, 32>}]} {
    %c0 = arith.constant 0 : index
    %c0_0 = arith.constant 0 : index
    %0 = vector.load %arg1[%c0, %c0_0] : memref<16x32xf32, #tpu.memory_space<vmem>>, vector<16x32xf32>
    %c0_1 = arith.constant 0 : index
    %c0_2 = arith.constant 0 : index
    %1 = vector.load %arg2[%c0_1, %c0_2] : memref<32x64xf32, #tpu.memory_space<vmem>>, vector<32x64xf32>
    %cst = arith.constant dense<0.000000e+00> : vector<16x64xf32>
    %2 = tpu.matmul %0, %1, %cst {dimension_numbers = #tpu.dot_dimension_numbers<[1], [0], [0], [1], [0, 0, 1, 1], [], []>} : vector<16x32xf32>, vector<32x64xf32>, vector<16x64xf32> -> vector<16x64xf32>
    %c0_3 = arith.constant 0 : index
    %c0_4 = arith.constant 0 : index
    %3 = vector.load %arg3[%c0_3, %c0_4] : memref<1x64xf32, #tpu.memory_space<vmem>>, vector<1x64xf32>
    %4 = vector.broadcast %3 : vector<1x64xf32> to vector<16x64xf32>
    %5 = arith.addf %2, %4 : vector<16x64xf32>
    %cst_5 = arith.constant 5.000000e-01 : f32
    %6 = vector.broadcast %cst_5 : f32 to vector<16x64xf32>
    %7 = arith.mulf %6, %5 : vector<16x64xf32>
    %cst_6 = arith.constant 0.707106769 : f32
    %8 = vector.broadcast %cst_6 : f32 to vector<16x64xf32>
    %9 = arith.mulf %5, %8 : vector<16x64xf32>
    %10 = math.erf %9 : vector<16x64xf32>
    %cst_7 = arith.constant 1.000000e+00 : f32
    %11 = vector.broadcast %cst_7 : f32 to vector<16x64xf32>
    %12 = arith.addf %11, %10 : vector<16x64xf32>
    %13 = arith.mulf %7, %12 : vector<16x64xf32>
    %c0_8 = arith.constant 0 : index
    %c0_9 = arith.constant 0 : index
    %14 = vector.load %arg4[%c0_8, %c0_9] : memref<64x32xf32, #tpu.memory_space<vmem>>, vector<64x32xf32>
    %cst_10 = arith.constant dense<0.000000e+00> : vector<16x32xf32>
    %15 = tpu.matmul %13, %14, %cst_10 {dimension_numbers = #tpu.dot_dimension_numbers<[1], [0], [0], [1], [0, 0, 1, 1], [], []>} : vector<16x64xf32>, vector<64x32xf32>, vector<16x32xf32> -> vector<16x32xf32>
    %c0_11 = arith.constant 0 : index
    %c0_12 = arith.constant 0 : index
    %16 = vector.load %arg5[%c0_11, %c0_12] : memref<1x32xf32, #tpu.memory_space<vmem>>, vector<1x32xf32>
    %17 = vector.broadcast %16 : vector<1x32xf32> to vector<16x32xf32>
    %18 = arith.addf %15, %17 : vector<16x32xf32>
    %c0_13 = arith.constant 0 : index
    %c0_14 = arith.constant 0 : index
    %19 = vector.load %arg6[%c0_13, %c0_14] : memref<16x32xf32, #tpu.memory_space<vmem>>, vector<16x32xf32>
    tpu.vector_store %arg6[%c0_13, %c0_14], %18 {strides = array<i32>} : memref<16x32xf32, #tpu.memory_space<vmem>>, vector<16x32xf32>,
    return
  }
  func.func @transform_0(%arg0: i32) -> (i32, i32) {
    %c0_i32 = arith.constant 0 : i32
    %c0_i32_0 = arith.constant 0 : i32
    return %arg0, %c0_i32 : i32, i32
  }
  func.func @transform_1(%arg0: i32) -> (i32, i32) {
    %c0_i32 = arith.constant 0 : i32
    %c0_i32_0 = arith.constant 0 : i32
    %c0_i32_1 = arith.constant 0 : i32
    return %c0_i32, %c0_i32_0 : i32, i32
  }
  func.func @transform_2(%arg0: i32) -> (i32, i32) {
    %c0_i32 = arith.constant 0 : i32
    %c0_i32_0 = arith.constant 0 : i32
    %c0_i32_1 = arith.constant 0 : i32
    return %c0_i32, %c0_i32_0 : i32, i32
  }
  func.func @transform_3(%arg0: i32) -> (i32, i32) {
    %c0_i32 = arith.constant 0 : i32
    %c0_i32_0 = arith.constant 0 : i32
    %c0_i32_1 = arith.constant 0 : i32
    return %c0_i32, %c0_i32_0 : i32, i32
  }
  func.func @transform_4(%arg0: i32) -> (i32, i32) {
    %c0_i32 = arith.constant 0 : i32
    %c0_i32_0 = arith.constant 0 : i32
    %c0_i32_1 = arith.constant 0 : i32
    return %c0_i32, %c0_i32_0 : i32, i32
  }
  func.func @transform_5(%arg0: i32) -> (i32, i32) {
    %c0_i32 = arith.constant 0 : i32
    %c0_i32_0 = arith.constant 0 : i32
    return %arg0, %c0_i32 : i32, i32
  }
}

</mosaic_0001>

<bundles_post_ra>
// kernel: tpu_custom_call.1
= control target key start
LH: loop header
LB: loop body
LE: loop exit
PB: predicated region body
PF: predicated region fallthrough
CT: control target
= control target key end

     0   :  { %vm34_vm0 = vcmask 261120   ;;  %s410_s0 = inlined_call_operand.vmem [shape: f32[16,32], index: 0, kind: input, shape index: {}]   ;;  %s411_s1 = inlined_call_operand.vmem [shape: f32[32,64], index: 1, kind: input, shape index: {}]   ;;  %s412_s2 = inlined_call_operand.vmem [shape: f32[1,64], index: 2, kind: input, shape index: {}]   ;;  %s413_s3 = inlined_call_operand.vmem [shape: f32[64,32], index: 3, kind: input, shape index: {}]   ;;  %s414_s4 = inlined_call_operand.vmem [shape: f32[1,32], index: 4, kind: input, shape index: {}]   ;;  %s415_s5 = inlined_call_operand.hbm [shape: f32[16,32], index: 5, kind: output, shape index: {}]  }
   0x1   :  { %v26_v0 = vld [vmem:[%s411_s1 + $0x18] sm:$0xff]  ;;  %v25_v1 = vld [vmem:[%s411_s1 + $0x10] sm:$0xff]  ;;  %v21_v2 = vld [vmem:[%s410_s0] sm:$0xff] }
   0x2   :  { %263 = vmatprep.subr.mxu0 %v26_v0  ;;  %v24_v3 = vld [vmem:[%s411_s1 + $0x8] sm:$0xff]  ;;  %271 = vmatprep.mubr.msk.f32.mxu0 %vm34_vm0, %v21_v2 }
   0x3   :  { %264 = vmatpush3.msra.mxu0 %v26_v0 }
   0x4   :  { %10 = vsyncpa [#allocation3], 0  ;;  %265 = vmatprep.subr.mxu0 %v25_v1  ;;  %v23_v4 = vld [vmem:[%s411_s1] sm:$0xff]  ;;  %v22_v5 = vld [vmem:[%s410_s0 + $0x8] sm:$0xff]  ;;  %vm141_vm1 = vcmask 523264   ;;  %s322_s21 = smov [#allocation2]  }
   0x5   :  { %266 = vmatpush3.msra.mxu0 %v25_v1  ;;  %v133_v6 = vld [vmem:[%s413_s3 + $0x38] sm:$0xff]  ;;  %v132_v7 = vld [vmem:[%s413_s3 + $0x30] sm:$0xff]  ;;  %v131_v8 = vld [vmem:[%s413_s3 + $0x28] sm:$0xff]  ;;  %s230_s22 = sshll.u32 %s322_s21, 4  ;;  %s231_s22 = int_to_ptr.vmem [resolvable:$true] %s230_s22 }
   0x6   :  { %267 = vmatprep.subr.mxu0 %v24_v3  ;;  %274 = vmatprep.subr.mxu1 %v133_v6  ;;  %v130_v9 = vld [vmem:[%s413_s3 + $0x20] sm:$0xff]  ;;  %v129_v10 = vld [vmem:[%s413_s3 + $0x18] sm:$0xff]  ;;  %v128_v11 = vld [vmem:[%s413_s3 + $0x10] sm:$0xff]  ;;  %s300_s23 = scalar_lea.vmem %s231_s22, 256  ;;  %p305_p1 = scmp.lt.s32.totalorder %s231_s22, %s231_s22 }
   0x7   :  { %268 = vmatpush3.msra.mxu0 %v24_v3  ;;  %275 = vmatpush3.msra.mxu1 %v133_v6  ;;  %v127_v12 = vld [vmem:[%s413_s3 + $0x8] sm:$0xff]  ;;  %v126_v13 = vld [vmem:[%s413_s3] sm:$0xff]  ;;  %p301_p0 = scmp.ne.s32.totalorder %s231_s22, %s300_s23  ;;  %p306_p2 = scmp.lt.s32.totalorder %s300_s23, %s300_s23 }
   0x8   :  { %269 = vmatprep.subr.mxu0 %v23_v4  ;;  %276 = vmatprep.subr.mxu1 %v132_v7  ;;  %v241_v14 = vld [vmem:[%s412_s2] ss:$0 sm:$0xff] }
   0x9   :  { %270 = vmatpush3.msra.mxu0 %v23_v4  ;;  %277 = vmatpush3.msra.mxu1 %v132_v7  ;;  %v244_v29 = vld [vmem:[%s414_s4] ss:$0 sm:$0xff]  ;;  %p307_p3 = por %p306_p2, %p305_p1 }
   0xa   :  { %272 = vmatmul.mubr.msk.f32.vlgmr.msra.gmra.mxu0 %vm34_vm0, %v22_v5  ;;  %278 = vmatprep.subr.mxu1 %v131_v8 }
   0xb   :  { %279 = vmatpush3.msra.mxu1 %v131_v8  ;;  %p308_p4 = pnand %p307_p3, %p301_p0 }
   0xc   :  { %280 = vmatprep.subr.mxu1 %v130_v9 }
   0xd   :  { %281 = vmatpush3.msra.mxu1 %v130_v9 }
   0xe   :  { %282 = vmatprep.subr.mxu1 %v129_v10 }
   0xf   :  { %283 = vmatpush3.msra.mxu1 %v129_v10 }
  0x10   :  { %284 = vmatprep.subr.mxu1 %v128_v11 }
  0x11   :  { %285 = vmatpush3.msra.mxu1 %v128_v11 }
  0x12   :  { %286 = vmatprep.subr.mxu1 %v127_v12 }
  0x13   :  { %287 = vmatpush3.msra.mxu1 %v127_v12 }
  0x14   :  { %288 = vmatprep.subr.mxu1 %v126_v13 }
  0x15   :  { %289 = vmatpush3.msra.mxu1 %v126_v13 }
  0xca   :  { %v273_v15 = vpop.f32.mrf.mxu0 }
  0xcb   :  { %v113_v16 = vadd.f32 %v273_v15, %v241_v14 }
  0xcc   :  { %v107_v17 = vpop.f32.mrf.mxu0 }
  0xcd   :  { %v119_v18 = vmul.f32 0.70710677, %v113_v16  ;;  %v108_v19 = vadd.f32 %v241_v14, %v107_v17  ;;  %v117_v26 = vmul.f32 0.5, %v113_v16 }
  0xcf   :  { %296 = verf.f32 %v119_v18  ;;  %v118_v20 = vmul.f32 0.70710677, %v108_v19  ;;  %v116_v24 = vmul.f32 0.5, %v108_v19 }
  0xd1   :  { %298 = verf.f32 %v118_v20 }
  0xdc   :  { %v297_v21 = vpop.eup %296 }
  0xdd   :  { %v123_v23 = vadd.f32 1.0, %v297_v21 }
  0xde   :  { %v299_v22 = vpop.eup %298 }
  0xdf   :  { %v122_v25 = vadd.f32 1.0, %v299_v22  ;;  %v125_v28 = vmul.f32 %v123_v23, %v117_v26 }
  0xe1   :  { %v124_v27 = vmul.f32 %v122_v25, %v116_v24 }
  0xe3   :  { %290 = vmatprep.mubr.msk.f32.mxu1 %vm141_vm1, %v124_v27 }
  0xe4   :  { %291 = vmatmul.mubr.msk.f32.vlgmr.msra.gmra.mxu1 %vm141_vm1, %v125_v28 }
 0x1a4   :  { %v292_v30 = vpop.f32.mrf.mxu1 }
 0x1a5   :  { %v220_v31 = vadd.f32 %v292_v30, %v244_v29 }
 0x1a6   :  { %v214_v32 = vpop.f32.mrf.mxu1 }
 0x1a7   :  { %224 = vst.msk [vmem:[#allocation2 + $0x8] sm:$0xff] %vm34_vm0, %v220_v31  ;;  %v215_v33 = vadd.f32 %v244_v29, %v214_v32 }
 0x1a9   :  { %223 = vst.msk [vmem:[#allocation2] sm:$0xff] %vm34_vm0, %v215_v33 }
 0x1aa   :  { %311 = shalt.err (!%p308_p4)
}
 0x1ab   :  { %s323_s24 = smov 128   ;;  %s324_s4 = smov 8  }
 0x1ac   :  { %236 = dma.vmem_to_hbm [thread:$0]  %s231_s22, 256, %s415_s5, [#allocation3], %s323_s24, %s323_s24, %s324_s4  }
 0x1ad   :  { %320 = dma.done.wait [#allocation3], 256  }
 0x1ae   :  { %321 = vsyncadd [#allocation3], 4294967040 }
 0x1af   :  { %240 = vsyncpa [#allocation3], 1 }

</bundles_post_ra>
